<compile_context>
chip_gen: v5e
topology: v5e:2x2
jax: 0.10.0
libtpu: 0.0.40
codegen_flags: <defaults>
</compile_context>

<pallas_src>
import functools
import math

import jax
import jax.numpy as jnp
from jax.experimental import pallas as pl
from jax.experimental.pallas import tpu as pltpu


def _round_up(x, m):
    return ((x + m - 1) // m) * m


def _relpos_kernel(band_ref, o_ref, *, length_q, length_k, tile_q):
    """One tile of q rows: out[i, :, :] = band[Lq-1-i : Lq-1-i+Lk, :]."""
    q0 = pl.program_id(0) * tile_q

    def body(r, carry):
        # Global q row i = q0 + r.  tile_q divides length_q exactly, so
        # i < length_q and start is always in [0, length_q - 1]; the slice
        # end start + length_k never exceeds the band's Lq + Lk - 1 rows.
        start = (length_q - 1 - q0) - r
        o_ref[r] = band_ref[pl.ds(start, length_k), :]
        return carry

    if tile_q <= 32:
        jax.lax.fori_loop(0, tile_q, body, 0, unroll=True)
    else:
        jax.lax.fori_loop(0, tile_q, body, 0)


def _pick_tile_q(length_q, length_k, num_units, band_rows):
    """Largest divisor of length_q whose double-buffered block fits VMEM."""
    lanes = _round_up(num_units, 128)          # lane padding of the last dim
    out_row_bytes = _round_up(length_k, 8) * lanes * 4
    band_bytes = _round_up(band_rows, 8) * lanes * 4
    budget = 24 * 1024 * 1024 - 2 * band_bytes  # stay under v7x scoped VMEM
    cap = max(1, budget // (2 * out_row_bytes))
    # Cap tiles so large length_q still produces many grid steps (pipelining
    # and both v7x TensorCores get work).
    cap = int(min(cap, 256, length_q))
    for d in range(cap, 0, -1):
        if length_q % d == 0:
            return d
    return 1


def relative_position(embeddings_table, length_q, length_k,
                      max_relative_position):
    """Pallas equivalent of RelativePosition.forward(length_q, length_k).

    embeddings_table: [2 * max_relative_position + 1, num_units]
    returns:          [length_q, length_k, num_units]
    """
    num_table_rows, num_units = embeddings_table.shape
    assert num_table_rows == 2 * max_relative_position + 1

    # Extended band table, built once in the wrapper (tiny precompute of size
    # (Lq + Lk - 1, U); the output is (Lq * Lk, U)).
    band_rows = length_q + length_k - 1
    p = jnp.arange(band_rows)
    rel = jnp.clip(p - (length_q - 1),
                   -max_relative_position, max_relative_position)
    band = embeddings_table[rel + max_relative_position]

    tile_q = _pick_tile_q(length_q, length_k, num_units, band_rows)
    grid = (length_q // tile_q,)

    kernel = functools.partial(
        _relpos_kernel,
        length_q=length_q,
        length_k=length_k,
        tile_q=tile_q,
    )

    out = pl.pallas_call(
        kernel,
        out_shape=jax.ShapeDtypeStruct((length_q, length_k, num_units),
                                       embeddings_table.dtype),
        grid_spec=pltpu.PrefetchScalarGridSpec(
            num_scalar_prefetch=0,
            grid=grid,
            in_specs=[
                # Tiny band table; constant index_map keeps it VMEM-resident.
                pl.BlockSpec((band_rows, num_units), lambda qi: (0, 0)),
            ],
            out_specs=pl.BlockSpec((tile_q, length_k, num_units),
                                   lambda qi: (qi, 0, 0)),
        ),
        compiler_params=pltpu.CompilerParams(
            dimension_semantics=("parallel",)),
    )(band)

    return out


def relative_position_ref(embeddings_table, length_q, length_k,
                          max_relative_position):
    """Pure-JAX reference matching the PyTorch forward."""
    range_q = jnp.arange(length_q)
    range_k = jnp.arange(length_k)
    distance_mat = range_k[None, :] - range_q[:, None]
    clipped = jnp.clip(distance_mat,
                       -max_relative_position, max_relative_position)
    final_mat = clipped + max_relative_position
    return embeddings_table[final_mat]


if __name__ == "__main__":
    key = jax.random.PRNGKey(0)

    num_units = 32
    max_relative_position = 4
    length_q = 8
    length_k = 8
    num_table_rows = 2 * max_relative_position + 1

    # Parameter initialized like nn.init.xavier_uniform_ in the module.
    bound = math.sqrt(6.0 / (num_table_rows + num_units))
    embeddings_table = jax.random.uniform(
        key, (num_table_rows, num_units), jnp.float32, -bound, bound)

    out = relative_position(embeddings_table, length_q, length_k,
                            max_relative_position)
    out = jax.block_until_ready(out)

    ref = relative_position_ref(embeddings_table, length_q, length_k,
                                max_relative_position)
    assert out.shape == (length_q, length_k, num_units)
    assert jnp.allclose(out, ref, atol=1e-6, rtol=1e-6), "mismatch vs reference"

    print("KERNEL_OK")
</pallas_src>

<mosaic_0001>
module attributes {stable_mosaic.version = 11 : i64} {
  func.func @_relpos_kernel(%arg0: i32, %arg1: memref<15x32xf32, #tpu.memory_space<vmem>>, %arg2: memref<8x8x32xf32, #tpu.memory_space<vmem>>) attributes {dimension_semantics = [#tpu.dimension_semantics<parallel>], iteration_bounds = array<i64: 1>, scalar_prefetch = 0 : i64, scratch_operands = 0 : i64, tpu.core_type = #tpu.core_type<tc>, window_params = [{pipeline_mode = #tpu.pipeline_mode<synchronous>, transform_indices = @transform_0, window_bounds = array<i64: 15, 32>}, {transform_indices = @transform_1, window_bounds = array<i64: 8, 8, 32>}]} {
    %c8_i32 = arith.constant 8 : i32
    %0 = arith.muli %arg0, %c8_i32 : i32
    %c0_i32 = arith.constant 0 : i32
    %c7_i32 = arith.constant 7 : i32
    %1 = arith.subi %c7_i32, %0 : i32
    %2 = arith.subi %1, %c0_i32 : i32
    %3 = arith.index_cast %2 : i32 to index
    %c0 = arith.constant 0 : index
    %4 = vector.load %arg1[%3, %c0] : memref<15x32xf32, #tpu.memory_space<vmem>>, vector<8x32xf32>
    %5 = arith.index_cast %c0_i32 : i32 to index
    %c0_0 = arith.constant 0 : index
    %c0_1 = arith.constant 0 : index
    %6 = vector.load %arg2[%5, %c0_0, %c0_1] : memref<8x8x32xf32, #tpu.memory_space<vmem>>, vector<1x8x32xf32>
    %7 = vector.shape_cast %6 : vector<1x8x32xf32> to vector<8x32xf32>
    %8 = vector.shape_cast %4 : vector<8x32xf32> to vector<1x8x32xf32>
    tpu.vector_store %arg2[%5, %c0_0, %c0_1], %8 {strides = array<i32>} : memref<8x8x32xf32, #tpu.memory_space<vmem>>, vector<1x8x32xf32>,
    %c1_i32 = arith.constant 1 : i32
    %c7_i32_2 = arith.constant 7 : i32
    %9 = arith.subi %c7_i32_2, %0 : i32
    %10 = arith.subi %9, %c1_i32 : i32
    %11 = arith.index_cast %10 : i32 to index
    %c0_3 = arith.constant 0 : index
    %12 = vector.load %arg1[%11, %c0_3] : memref<15x32xf32, #tpu.memory_space<vmem>>, vector<8x32xf32>
    %13 = arith.index_cast %c1_i32 : i32 to index
    %c0_4 = arith.constant 0 : index
    %c0_5 = arith.constant 0 : index
    %14 = vector.load %arg2[%13, %c0_4, %c0_5] : memref<8x8x32xf32, #tpu.memory_space<vmem>>, vector<1x8x32xf32>
    %15 = vector.shape_cast %14 : vector<1x8x32xf32> to vector<8x32xf32>
    %16 = vector.shape_cast %12 : vector<8x32xf32> to vector<1x8x32xf32>
    tpu.vector_store %arg2[%13, %c0_4, %c0_5], %16 {strides = array<i32>} : memref<8x8x32xf32, #tpu.memory_space<vmem>>, vector<1x8x32xf32>,
    %c2_i32 = arith.constant 2 : i32
    %c7_i32_6 = arith.constant 7 : i32
    %17 = arith.subi %c7_i32_6, %0 : i32
    %18 = arith.subi %17, %c2_i32 : i32
    %19 = arith.index_cast %18 : i32 to index
    %c0_7 = arith.constant 0 : index
    %20 = vector.load %arg1[%19, %c0_7] : memref<15x32xf32, #tpu.memory_space<vmem>>, vector<8x32xf32>
    %21 = arith.index_cast %c2_i32 : i32 to index
    %c0_8 = arith.constant 0 : index
    %c0_9 = arith.constant 0 : index
    %22 = vector.load %arg2[%21, %c0_8, %c0_9] : memref<8x8x32xf32, #tpu.memory_space<vmem>>, vector<1x8x32xf32>
    %23 = vector.shape_cast %22 : vector<1x8x32xf32> to vector<8x32xf32>
    %24 = vector.shape_cast %20 : vector<8x32xf32> to vector<1x8x32xf32>
    tpu.vector_store %arg2[%21, %c0_8, %c0_9], %24 {strides = array<i32>} : memref<8x8x32xf32, #tpu.memory_space<vmem>>, vector<1x8x32xf32>,
    %c3_i32 = arith.constant 3 : i32
    %c7_i32_10 = arith.constant 7 : i32
    %25 = arith.subi %c7_i32_10, %0 : i32
    %26 = arith.subi %25, %c3_i32 : i32
    %27 = arith.index_cast %26 : i32 to index
    %c0_11 = arith.constant 0 : index
    %28 = vector.load %arg1[%27, %c0_11] : memref<15x32xf32, #tpu.memory_space<vmem>>, vector<8x32xf32>
    %29 = arith.index_cast %c3_i32 : i32 to index
    %c0_12 = arith.constant 0 : index
    %c0_13 = arith.constant 0 : index
    %30 = vector.load %arg2[%29, %c0_12, %c0_13] : memref<8x8x32xf32, #tpu.memory_space<vmem>>, vector<1x8x32xf32>
    %31 = vector.shape_cast %30 : vector<1x8x32xf32> to vector<8x32xf32>
    %32 = vector.shape_cast %28 : vector<8x32xf32> to vector<1x8x32xf32>
    tpu.vector_store %arg2[%29, %c0_12, %c0_13], %32 {strides = array<i32>} : memref<8x8x32xf32, #tpu.memory_space<vmem>>, vector<1x8x32xf32>,
    %c4_i32 = arith.constant 4 : i32
    %c7_i32_14 = arith.constant 7 : i32
    %33 = arith.subi %c7_i32_14, %0 : i32
    %34 = arith.subi %33, %c4_i32 : i32
    %35 = arith.index_cast %34 : i32 to index
    %c0_15 = arith.constant 0 : index
    %36 = vector.load %arg1[%35, %c0_15] : memref<15x32xf32, #tpu.memory_space<vmem>>, vector<8x32xf32>
    %37 = arith.index_cast %c4_i32 : i32 to index
    %c0_16 = arith.constant 0 : index
    %c0_17 = arith.constant 0 : index
    %38 = vector.load %arg2[%37, %c0_16, %c0_17] : memref<8x8x32xf32, #tpu.memory_space<vmem>>, vector<1x8x32xf32>
    %39 = vector.shape_cast %38 : vector<1x8x32xf32> to vector<8x32xf32>
    %40 = vector.shape_cast %36 : vector<8x32xf32> to vector<1x8x32xf32>
    tpu.vector_store %arg2[%37, %c0_16, %c0_17], %40 {strides = array<i32>} : memref<8x8x32xf32, #tpu.memory_space<vmem>>, vector<1x8x32xf32>,
    %c5_i32 = arith.constant 5 : i32
    %c7_i32_18 = arith.constant 7 : i32
    %41 = arith.subi %c7_i32_18, %0 : i32
    %42 = arith.subi %41, %c5_i32 : i32
    %43 = arith.index_cast %42 : i32 to index
    %c0_19 = arith.constant 0 : index
    %44 = vector.load %arg1[%43, %c0_19] : memref<15x32xf32, #tpu.memory_space<vmem>>, vector<8x32xf32>
    %45 = arith.index_cast %c5_i32 : i32 to index
    %c0_20 = arith.constant 0 : index
    %c0_21 = arith.constant 0 : index
    %46 = vector.load %arg2[%45, %c0_20, %c0_21] : memref<8x8x32xf32, #tpu.memory_space<vmem>>, vector<1x8x32xf32>
    %47 = vector.shape_cast %46 : vector<1x8x32xf32> to vector<8x32xf32>
    %48 = vector.shape_cast %44 : vector<8x32xf32> to vector<1x8x32xf32>
    tpu.vector_store %arg2[%45, %c0_20, %c0_21], %48 {strides = array<i32>} : memref<8x8x32xf32, #tpu.memory_space<vmem>>, vector<1x8x32xf32>,
    %c6_i32 = arith.constant 6 : i32
    %c7_i32_22 = arith.constant 7 : i32
    %49 = arith.subi %c7_i32_22, %0 : i32
    %50 = arith.subi %49, %c6_i32 : i32
    %51 = arith.index_cast %50 : i32 to index
    %c0_23 = arith.constant 0 : index
    %52 = vector.load %arg1[%51, %c0_23] : memref<15x32xf32, #tpu.memory_space<vmem>>, vector<8x32xf32>
    %53 = arith.index_cast %c6_i32 : i32 to index
    %c0_24 = arith.constant 0 : index
    %c0_25 = arith.constant 0 : index
    %54 = vector.load %arg2[%53, %c0_24, %c0_25] : memref<8x8x32xf32, #tpu.memory_space<vmem>>, vector<1x8x32xf32>
    %55 = vector.shape_cast %54 : vector<1x8x32xf32> to vector<8x32xf32>
    %56 = vector.shape_cast %52 : vector<8x32xf32> to vector<1x8x32xf32>
    tpu.vector_store %arg2[%53, %c0_24, %c0_25], %56 {strides = array<i32>} : memref<8x8x32xf32, #tpu.memory_space<vmem>>, vector<1x8x32xf32>,
    %c7_i32_26 = arith.constant 7 : i32
    %c7_i32_27 = arith.constant 7 : i32
    %57 = arith.subi %c7_i32_27, %0 : i32
    %58 = arith.subi %57, %c7_i32_26 : i32
    %59 = arith.index_cast %58 : i32 to index
    %c0_28 = arith.constant 0 : index
    %60 = vector.load %arg1[%59, %c0_28] : memref<15x32xf32, #tpu.memory_space<vmem>>, vector<8x32xf32>
    %61 = arith.index_cast %c7_i32_26 : i32 to index
    %c0_29 = arith.constant 0 : index
    %c0_30 = arith.constant 0 : index
    %62 = vector.load %arg2[%61, %c0_29, %c0_30] : memref<8x8x32xf32, #tpu.memory_space<vmem>>, vector<1x8x32xf32>
    %63 = vector.shape_cast %62 : vector<1x8x32xf32> to vector<8x32xf32>
    %64 = vector.shape_cast %60 : vector<8x32xf32> to vector<1x8x32xf32>
    tpu.vector_store %arg2[%61, %c0_29, %c0_30], %64 {strides = array<i32>} : memref<8x8x32xf32, #tpu.memory_space<vmem>>, vector<1x8x32xf32>,
    %c8_i32_31 = arith.constant 8 : i32
    return
  }
  func.func @transform_0(%arg0: i32) -> (i32, i32) {
    %c0_i32 = arith.constant 0 : i32
    %c0_i32_0 = arith.constant 0 : i32
    %c0_i32_1 = arith.constant 0 : i32
    return %c0_i32, %c0_i32_0 : i32, i32
  }
  func.func @transform_1(%arg0: i32) -> (i32, i32, i32) {
    %c0_i32 = arith.constant 0 : i32
    %c0_i32_0 = arith.constant 0 : i32
    %c0_i32_1 = arith.constant 0 : i32
    return %arg0, %c0_i32, %c0_i32_0 : i32, i32, i32
  }
}

</mosaic_0001>

<bundles_post_ra>
// kernel: tpu_custom_call.1
= control target key start
LH: loop header
LB: loop body
LE: loop exit
PB: predicated region body
PF: predicated region fallthrough
CT: control target
= control target key end

     0   :  { %6 = vsyncpa [#allocation3], 0  ;;  %s183_s0 = inlined_call_operand.hbm [shape: f32[15,32], index: 0, kind: input, shape index: {}]   ;;  %s184_s1 = inlined_call_operand.hbm [shape: f32[8,8,32], index: 1, kind: output, shape index: {}]  }
   0x1   :  { %7 = vsyncpa [#allocation4], 0  ;;  %s12_s8 = sshll.u32 %s183_s0, 4  ;;  %s149_s9 = smov [#allocation2]   ;;  %s13_s8 = int_to_ptr.hbm [resolvable:$true] %s12_s8 }
   0x2   :  { %s14_s10 = sshll.u32 %s149_s9, 4  ;;  %s150_s11 = smov 128   ;;  %s15_s10 = int_to_ptr.vmem [resolvable:$true] %s14_s10 }
   0x3   :  { %s151_s12 = smov 8  }
   0x4   :  { %20 = dma.hbm_to_vmem [thread:$0]  %s13_s8, 256, %s15_s10, [#allocation3], %s150_s11, %s150_s11, %s151_s12  }
   0x5   :  { %145 = dma.done.wait [#allocation3], 256  }
   0x6   :  { %146 = vsyncadd [#allocation3], 4294967040  ;;  %vm29_vm0 = vcmask 261120   ;;  %v28_v0 = vld [vmem:[#allocation2 + $0x7] sm:$0xff]  ;;  %s152_s0 = smov [#allocation5]   ;;  %s72_s16 = sshll.u32 %s184_s1, 4  ;;  %s73_s16 = int_to_ptr.hbm [resolvable:$true] %s72_s16 }
   0x7   :  { %v33_v1 = vld [vmem:[#allocation2 + $0x6] sm:$0xff]  ;;  %30 = vst.msk [vmem:[#allocation5] sm:$0xff] %vm29_vm0, %v28_v0  ;;  %s70_s13 = sshll.u32 %s152_s0, 4  ;;  %s71_s13 = int_to_ptr.vmem [resolvable:$true] %s70_s13 }
   0x8   :  { %v38_v2 = vld [vmem:[#allocation2 + $0x5] sm:$0xff]  ;;  %35 = vst.msk [vmem:[#allocation5 + $0x8] sm:$0xff] %vm29_vm0, %v33_v1 }
   0x9   :  { %v43_v3 = vld [vmem:[#allocation2 + $0x4] sm:$0xff]  ;;  %40 = vst.msk [vmem:[#allocation5 + $0x10] sm:$0xff] %vm29_vm0, %v38_v2 }
   0xa   :  { %v48_v4 = vld [vmem:[#allocation2 + $0x3] sm:$0xff]  ;;  %45 = vst.msk [vmem:[#allocation5 + $0x18] sm:$0xff] %vm29_vm0, %v43_v3 }
   0xb   :  { %v53_v5 = vld [vmem:[#allocation2 + $0x2] sm:$0xff]  ;;  %50 = vst.msk [vmem:[#allocation5 + $0x20] sm:$0xff] %vm29_vm0, %v48_v4 }
   0xc   :  { %v58_v6 = vld [vmem:[#allocation2 + $0x1] sm:$0xff]  ;;  %55 = vst.msk [vmem:[#allocation5 + $0x28] sm:$0xff] %vm29_vm0, %v53_v5 }
   0xd   :  { %v63_v7 = vld [vmem:[#allocation2] sm:$0xff]  ;;  %60 = vst.msk [vmem:[#allocation5 + $0x30] sm:$0xff] %vm29_vm0, %v58_v6 }
   0xe   :  { %65 = vst.msk [vmem:[#allocation5 + $0x38] sm:$0xff] %vm29_vm0, %v63_v7 }
   0xf   :  { %78 = dma.vmem_to_hbm [thread:$0]  %s71_s13, 1024, %s73_s16, [#allocation4], %s150_s11, %s150_s11, %s151_s12  }
  0x10   :  { %147 = dma.done.wait [#allocation4], 1024  }
  0x11   :  { %148 = vsyncadd [#allocation4], 4294966272 }
  0x12   :  { %83 = vsyncpa [#allocation3], 1 }
  0x13   :  { %84 = vsyncpa [#allocation4], 1 }

</bundles_post_ra>
